<compile_context>
chip_gen: v6e
topology: v6e:2x2x1
jax: 0.10.0
libtpu: 0.0.40
codegen_flags: <defaults>
</compile_context>

<pallas_src>
import functools

import jax
import jax.numpy as jnp
from jax import lax
from jax.experimental import pallas as pl
from jax.experimental.pallas import tpu as pltpu


def _sparse_token_kernel(patches_ref, wconv_ref, wlin_t_ref, conv_ref, tok_ref):
    """Fused im2col-conv + token Linear for one batch tile.

    patches_ref: (Bt, HW, Kp)  im2col patches, Kp = 9*C + 1 (last column == 1.0: conv bias)
    wconv_ref  : (Kp, D)       conv weights, rows ordered (kh, kw, c), last row = conv bias
    wlin_t_ref : (HW, N)       linear weights, pre-transposed (in_features, out_features)
    conv_ref   : (Bt, D, HW)   conv output, NCHW-flat (lane axis = HW -> lane-dense store)
    tok_ref    : (Bt, D, N)    tokens; (D,N)->(N,D) fix-up + linear bias added in the wrapper
    """
    bt, hw, kp = patches_ref.shape
    d = wconv_ref.shape[1]
    n = wlin_t_ref.shape[1]

    # --- conv: ONE MXU matmul for the whole batch tile, f32 accumulation. ---
    if hw % 8 == 0:
        # (Bt, HW) merge is sublane-aligned -> free reshape, single 2-D dot.
        p2 = patches_ref[...].reshape(bt * hw, kp)
        conv = jnp.dot(p2, wconv_ref[...],
                       preferred_element_type=jnp.float32).reshape(bt, hw, d)
    else:
        # Odd HW (e.g. 7x7 stages): keep Bt as a free dim, avoid a hidden relayout copy.
        conv = lax.dot_general(patches_ref[...], wconv_ref[...],
                               dimension_numbers=(((2,), (0,)), ((), ())),
                               preferred_element_type=jnp.float32)

    # --- ONE batched transpose to NCHW-flat layout + ONE full-block store. ---
    conv_t = jnp.swapaxes(conv, 1, 2)                      # (Bt, D, HW), f32
    conv_ref[...] = conv_t.astype(conv_ref.dtype)

    # --- tokens: ONE MXU matmul for the whole tile; Wlin loaded once; cast hoisted. ---
    lhs = conv_t.astype(wlin_t_ref.dtype)                  # single batched cast (bf16 path)
    if d % 8 == 0:
        tok = jnp.dot(lhs.reshape(bt * d, hw), wlin_t_ref[...],
                      preferred_element_type=jnp.float32).reshape(bt, d, n)
    else:
        tok = lax.dot_general(lhs, wlin_t_ref[...],
                              dimension_numbers=(((2,), (0,)), ((), ())),
                              preferred_element_type=jnp.float32)
    tok_ref[...] = tok.astype(tok_ref.dtype)


def _single_core_chip():
    """True for single-TensorCore chips (v5e / v6e); False for megacore parts (v4/v5p/v7x)."""
    try:
        kind = jax.devices()[0].device_kind.lower()
    except Exception:
        return False
    return any(tag in kind for tag in
               ("v5e", "v5 lite", "v5lite", "v6e", "v6 lite", "v6lite"))


def _pick_batch_tile(B, HW, Kp, D, N, in_bytes, out_bytes, single_core):
    """Per-step batch tile Bt (must divide B).

    Single-TC chips: one big step (512-1024 MXU rows) to amortize the ~0.35us/step overhead.
    Dual-TC chips: keep >= 2 'parallel' grid steps (>= 256 rows each) so both cores work.
    Always capped by a VMEM estimate that fits the 64 MiB v7x part with double-buffering.
    """
    def vmem_est(bt):
        per_img = (2 * HW * Kp * in_bytes        # double-buffered patches block
                   + 2 * D * HW * out_bytes      # double-buffered conv-out block
                   + 2 * D * N * out_bytes       # double-buffered token block
                   + 2 * HW * D * 4)             # f32 conv intermediate + transposed copy
        weights = 2 * (Kp * D + HW * N) * in_bytes
        return bt * per_img + weights

    target_rows = 1024 if single_core else 256
    bt = max(1, min(B, -(-target_rows // HW)))
    if not single_core and B >= 2:
        bt = min(bt, max(1, B // 2))             # keep >= 2 grid steps for 2 TensorCores
    while bt > 1 and vmem_est(bt) > 24 * 1024 * 1024:
        bt -= 1
    while B % bt:
        bt -= 1
    return bt


def sparse_token_forward(x, conv_w, conv_b, lin_w, lin_b, *,
                         batch_tile=None, mxu_dtype=jnp.bfloat16,
                         allow_input_fusion=True):
    """SparseToken forward.  x: (B, H, W, C).

    Returns (sparse_token (B, N, D), conv_out (B, D, H, W)).

    mxu_dtype: dtype fed to the MXU.  bfloat16 (default) is the fast path on v5e/v6e and
    halves the dominant patch DMA bytes; accumulation, outputs and element-wise math stay
    float32.  Pass jnp.float32 (or None) for the exact path.
    """
    B, H, W, C = x.shape
    D = conv_w.shape[0]              # ltoken_dim (conv out_channels)
    N = lin_w.shape[0]               # ltoken_num
    HW = H * W
    out_dtype = x.dtype
    if mxu_dtype is None:
        mxu_dtype = x.dtype

    # ---- wrapper-side im2col: pad + 9 shifted slices + concat fuse into one XLA fusion.
    #      Kp stays at 9*C + 1 (no 128-lane padding): full-extent last dim is layout-legal
    #      and this cuts the dominant activation HBM traffic ~3.5x at C=4. ----
    xpad = jnp.pad(x, ((0, 0), (1, 1), (1, 1), (0, 0)))
    cols = [xpad[:, kh:kh + H, kw:kw + W, :] for kh in range(3) for kw in range(3)]
    patches = jnp.concatenate(cols, axis=-1).reshape(B, HW, 9 * C)   # feature = (kh, kw, c)

    K = 9 * C
    Kp = K + 1                       # +1: constant-ones column carries the conv bias
    patches_aug = jnp.concatenate(
        [patches, jnp.ones((B, HW, 1), patches.dtype)], axis=-1).astype(mxu_dtype)

    wconv_mat = jnp.transpose(conv_w, (2, 3, 1, 0)).reshape(K, D)    # rows ordered (kh, kw, c)
    wconv_aug = jnp.concatenate([wconv_mat, conv_b.reshape(1, D)], axis=0).astype(mxu_dtype)

    wlin_t = jnp.transpose(lin_w).astype(mxu_dtype)                  # (HW, N) pre-transposed

    in_bytes = jnp.dtype(mxu_dtype).itemsize
    out_bytes = jnp.dtype(out_dtype).itemsize
    if batch_tile is None:
        bt = _pick_batch_tile(B, HW, Kp, D, N, in_bytes, out_bytes, _single_core_chip())
    else:
        bt = max(1, min(batch_tile, B))
        while B % bt:
            bt -= 1

    compiler_params = pltpu.CompilerParams(
        dimension_semantics=("parallel",),
        # Allow tiles bigger than the 16/32 MiB scoped defaults; still < the 64 MiB v7x part.
        vmem_limit_bytes=48 * 1024 * 1024,
        # Let XLA fuse the im2col producer into the patches operand (no extra HBM round trip).
        allow_input_fusion=[True, False, False] if allow_input_fusion else None,
    )

    conv_flat, tok_dn = pl.pallas_call(
        _sparse_token_kernel,
        out_shape=(jax.ShapeDtypeStruct((B, D, HW), out_dtype),      # NCHW-flat conv output
                   jax.ShapeDtypeStruct((B, D, N), out_dtype)),      # tokens, (D, N) layout
        grid=(B // bt,),
        in_specs=[
            pl.BlockSpec((bt, HW, Kp), lambda i: (i, 0, 0)),
            pl.BlockSpec((Kp, D), lambda i: (0, 0)),
            pl.BlockSpec((HW, N), lambda i: (0, 0)),
        ],
        out_specs=(
            pl.BlockSpec((bt, D, HW), lambda i: (i, 0, 0)),
            pl.BlockSpec((bt, D, N), lambda i: (i, 0, 0)),
        ),
        compiler_params=compiler_params,
    )(patches_aug, wconv_aug, wlin_t)

    # Tiny fix-ups in the wrapper: (B, D, N) -> (B, N, D) and the linear bias add.
    tok = jnp.swapaxes(tok_dn, 1, 2) + lin_b.reshape(1, N, 1).astype(out_dtype)
    # conv_flat is already flattened NCHW, so this reshape is free (no transpose).
    conv_nchw = conv_flat.reshape(B, D, H, W)
    return tok, conv_nchw


def _reference(x, conv_w, conv_b, lin_w, lin_b):
    """Pure-JAX reference mirroring the PyTorch forward exactly."""
    x_nchw = jnp.transpose(x, (0, 3, 1, 2))
    conv = lax.conv_general_dilated(
        x_nchw, conv_w, window_strides=(1, 1), padding="SAME",
        dimension_numbers=("NCHW", "OIHW", "NCHW"))
    conv = conv + conv_b.reshape(1, -1, 1, 1)
    B, D, H, W = conv.shape
    flat = conv.reshape(B, D, H * W)
    tok = jnp.einsum("bdp,np->bdn", flat, lin_w) + lin_b
    tok = jnp.transpose(tok, (0, 2, 1))
    return tok, conv


if __name__ == "__main__":
    # SparseToken(in_channels=4, hw_size=16, ltoken_num=8, ltoken_dim=32)
    B, H, W, C = 2, 16, 16, 4
    ltoken_num, ltoken_dim = 8, 32

    key = jax.random.PRNGKey(0)
    k_x, k_cw, k_cb, k_lw, k_lb = jax.random.split(key, 5)

    x = jax.random.normal(k_x, (B, H, W, C), dtype=jnp.float32)
    conv_w = 0.1 * jax.random.normal(k_cw, (ltoken_dim, C, 3, 3), dtype=jnp.float32)
    conv_b = 0.1 * jax.random.normal(k_cb, (ltoken_dim,), dtype=jnp.float32)
    lin_w = 0.1 * jax.random.normal(k_lw, (ltoken_num, H * W), dtype=jnp.float32)
    lin_b = 0.1 * jax.random.normal(k_lb, (ltoken_num,), dtype=jnp.float32)

    tok_ref, conv_ref_out = _reference(x, conv_w, conv_b, lin_w, lin_b)

    # Default fast path: bf16 MXU inputs, f32 accumulation and f32 outputs.
    tok, conv_out = jax.jit(sparse_token_forward)(x, conv_w, conv_b, lin_w, lin_b)
    jax.block_until_ready((tok, conv_out))
    assert tok.shape == (B, ltoken_num, ltoken_dim)
    assert conv_out.shape == (B, ltoken_dim, H, W)
    assert jnp.allclose(tok, tok_ref, atol=5e-2, rtol=5e-2)
    assert jnp.allclose(conv_out, conv_ref_out, atol=5e-2, rtol=5e-2)

    # Exact path (float32 end to end) for bit-accuracy checks.
    fwd_f32 = jax.jit(functools.partial(sparse_token_forward, mxu_dtype=jnp.float32))
    tok32, conv32 = fwd_f32(x, conv_w, conv_b, lin_w, lin_b)
    jax.block_until_ready((tok32, conv32))
    assert jnp.allclose(tok32, tok_ref, atol=1e-3, rtol=1e-3)
    assert jnp.allclose(conv32, conv_ref_out, atol=1e-3, rtol=1e-3)

    print("KERNEL_OK")
</pallas_src>

<mosaic_0001>
module attributes {stable_mosaic.version = 11 : i64} {
  func.func @_sparse_token_kernel(%arg0: i32, %arg1: memref<1x256x37xbf16, #tpu.memory_space<vmem>>, %arg2: memref<37x32xbf16, #tpu.memory_space<vmem>>, %arg3: memref<256x8xbf16, #tpu.memory_space<vmem>>, %arg4: memref<1x32x256xf32, #tpu.memory_space<vmem>>, %arg5: memref<1x32x8xf32, #tpu.memory_space<vmem>>) attributes {dimension_semantics = [#tpu.dimension_semantics<parallel>], iteration_bounds = array<i64: 2>, scalar_prefetch = 0 : i64, scratch_operands = 0 : i64, tpu.core_type = #tpu.core_type<tc>, window_params = [{transform_indices = @transform_0, window_bounds = array<i64: 1, 256, 37>}, {pipeline_mode = #tpu.pipeline_mode<synchronous>, transform_indices = @transform_1, window_bounds = array<i64: 37, 32>}, {pipeline_mode = #tpu.pipeline_mode<synchronous>, transform_indices = @transform_2, window_bounds = array<i64: 256, 8>}, {transform_indices = @transform_3, window_bounds = array<i64: 1, 32, 256>}, {transform_indices = @transform_4, window_bounds = array<i64: 1, 32, 8>}]} {
    %c0 = arith.constant 0 : index
    %c0_0 = arith.constant 0 : index
    %c0_1 = arith.constant 0 : index
    %0 = vector.load %arg1[%c0, %c0_0, %c0_1] : memref<1x256x37xbf16, #tpu.memory_space<vmem>>, vector<1x256x37xbf16>
    %1 = vector.shape_cast %0 : vector<1x256x37xbf16> to vector<256x37xbf16>
    %c0_2 = arith.constant 0 : index
    %c0_3 = arith.constant 0 : index
    %2 = vector.load %arg2[%c0_2, %c0_3] : memref<37x32xbf16, #tpu.memory_space<vmem>>, vector<37x32xbf16>
    %cst = arith.constant dense<0.000000e+00> : vector<256x32xf32>
    %3 = tpu.matmul %1, %2, %cst {dimension_numbers = #tpu.dot_dimension_numbers<[1], [0], [0], [1], [0, 0, 1, 1], [], []>} : vector<256x37xbf16>, vector<37x32xbf16>, vector<256x32xf32> -> vector<256x32xf32>
    %4 = vector.shape_cast %3 : vector<256x32xf32> to vector<1x256x32xf32>
    %5 = tpu.transpose %4, [0, 2, 1] : vector<1x256x32xf32> -> vector<1x32x256xf32>
    %c0_4 = arith.constant 0 : index
    %c0_5 = arith.constant 0 : index
    %c0_6 = arith.constant 0 : index
    %6 = vector.load %arg4[%c0_4, %c0_5, %c0_6] : memref<1x32x256xf32, #tpu.memory_space<vmem>>, vector<1x32x256xf32>
    tpu.vector_store %arg4[%c0_4, %c0_5, %c0_6], %5 {strides = array<i32>} : memref<1x32x256xf32, #tpu.memory_space<vmem>>, vector<1x32x256xf32>,
    %7 = arith.truncf %5 : vector<1x32x256xf32> to vector<1x32x256xbf16>
    %8 = vector.shape_cast %7 : vector<1x32x256xbf16> to vector<32x256xbf16>
    %c0_7 = arith.constant 0 : index
    %c0_8 = arith.constant 0 : index
    %9 = vector.load %arg3[%c0_7, %c0_8] : memref<256x8xbf16, #tpu.memory_space<vmem>>, vector<256x8xbf16>
    %cst_9 = arith.constant dense<0.000000e+00> : vector<32x8xf32>
    %10 = tpu.matmul %8, %9, %cst_9 {dimension_numbers = #tpu.dot_dimension_numbers<[1], [0], [0], [1], [0, 0, 1, 1], [], []>} : vector<32x256xbf16>, vector<256x8xbf16>, vector<32x8xf32> -> vector<32x8xf32>
    %11 = vector.shape_cast %10 : vector<32x8xf32> to vector<1x32x8xf32>
    %c0_10 = arith.constant 0 : index
    %c0_11 = arith.constant 0 : index
    %c0_12 = arith.constant 0 : index
    %12 = vector.load %arg5[%c0_10, %c0_11, %c0_12] : memref<1x32x8xf32, #tpu.memory_space<vmem>>, vector<1x32x8xf32>
    tpu.vector_store %arg5[%c0_10, %c0_11, %c0_12], %11 {strides = array<i32>} : memref<1x32x8xf32, #tpu.memory_space<vmem>>, vector<1x32x8xf32>,
    return
  }
  func.func @transform_0(%arg0: i32) -> (i32, i32, i32) {
    %c0_i32 = arith.constant 0 : i32
    %c0_i32_0 = arith.constant 0 : i32
    %c0_i32_1 = arith.constant 0 : i32
    return %arg0, %c0_i32, %c0_i32_0 : i32, i32, i32
  }
  func.func @transform_1(%arg0: i32) -> (i32, i32) {
    %c0_i32 = arith.constant 0 : i32
    %c0_i32_0 = arith.constant 0 : i32
    %c0_i32_1 = arith.constant 0 : i32
    return %c0_i32, %c0_i32_0 : i32, i32
  }
  func.func @transform_2(%arg0: i32) -> (i32, i32) {
    %c0_i32 = arith.constant 0 : i32
    %c0_i32_0 = arith.constant 0 : i32
    %c0_i32_1 = arith.constant 0 : i32
    return %c0_i32, %c0_i32_0 : i32, i32
  }
  func.func @transform_3(%arg0: i32) -> (i32, i32, i32) {
    %c0_i32 = arith.constant 0 : i32
    %c0_i32_0 = arith.constant 0 : i32
    %c0_i32_1 = arith.constant 0 : i32
    return %arg0, %c0_i32, %c0_i32_0 : i32, i32, i32
  }
  func.func @transform_4(%arg0: i32) -> (i32, i32, i32) {
    %c0_i32 = arith.constant 0 : i32
    %c0_i32_0 = arith.constant 0 : i32
    %c0_i32_1 = arith.constant 0 : i32
    return %arg0, %c0_i32, %c0_i32_0 : i32, i32, i32
  }
}

</mosaic_0001>

<bundles_post_ra>
// kernel: sparse_token_forward.2
= control target key start
LH: loop header
LB: loop body
LE: loop exit
PB: predicated region body
PF: predicated region fallthrough
CT: control target
= control target key end

     0   :  { %s1920_s20 = smov 0   ;;  %s2167_s0 = inlined_call_operand.vmem [shape: bf16[37,32], index: 0, kind: input, shape index: {}]   ;;  %s2168_s1 = inlined_call_operand.vmem [shape: bf16[256,8], index: 1, kind: input, shape index: {}]   ;;  %s2169_s2 = inlined_call_operand.vmem [shape: bf16[2,256,36], index: 2, kind: input, shape index: {}]   ;;  %s2170_s3 = inlined_call_operand.<no memory space> [shape: bf16[], index: 3, kind: input, shape index: {}]   ;;  %s2171_s4 = inlined_call_operand.vmem [shape: f32[2,32,256], index: 4, kind: output, shape index: {0}]   ;;  %s2172_s5 = inlined_call_operand.vmem [shape: f32[2,32,8], index: 5, kind: output, shape index: {1}]  }
   0x1   :  { %v11_v0 = vstv %s2170_s3 }
   0x2   :  { %v1918_v1 = vunpack.i.l.bf16 %v11_v0 }
   0x3 LB: > { %s1647_s21 = sadd.s32 4294967295, %s1881_s20   ;;  %p1651_p0 = scmp.ge.s32.totalorder %s1881_s20, 1  ;;  %s1881_s20 = sphi %s1920_s20, %s21_s20  }
   0x4   : > { %p171_p1 = scmp.lt.s32.totalorder %s1881_s20, 3 }
   0x6   : > { %p172_p2 = pnand %p1651_p0, %p171_p1 }
   0x8   : > { %175 = sbr.rel (%p172_p2) target bundleno = 603 (0x25b), region = 32 }
   0xd   : > { %v1840_v2 = vld [vmem:[%s2167_s0 + $0x10] ss:$0 sps:$4 sm:$0x77]   ;;  %vm1133_vm0 = vcmask 1041408   ;;  %vm1134_vm1 = vcmask 1042432   ;;  %v229_v3 = vlaneseq  ;;  %v1883_v4 = vmov 65535  }
   0xe   : > { %v1135_v5 = vsel %vm1133_vm0, 4294967295, %v1883_v4  ;;  %v1841_v7 = vld [vmem:[%s2167_s0 + $0x8] sm:$0xff]   ;;  %p202_p3 = scmp.lt.s32.totalorder %s1647_s21, 1  ;;  %v1842_v10 = vld [vmem:[%s2167_s0] sm:$0xff]   ;;  %v1884_v27 = vmov 0.0   ;;  %vm1084_vm3 = vcmask 302080  }
   0xf   : > { %v1136_v6 = vsel %vm1134_vm1, %v1135_v5, 0  ;;  %v1936_v9 = vand.u32 127, %v229_v3  ;;  %vm1554_vm4 = vcmask 64512  }
  0x10   : > { %v1138_v8 = vand.u32 %v1840_v2, %v1136_v6  ;;  %s2174_s21 = smov (!%p202_p3, %s1647_s21), 1 }
  0x11   : > { %s1742_s27 = sshll.u32 %s2174_s21, 7  ;;  %vm232_vm2 = vcmp.lt.s32.totalorder %v1936_v9, 36  ;;  %s1743_s14 = sshll.u32 %s2174_s21, 6 }
  0x12   : > { %1792 = vmatprep.subr.bf16.mxu0 %v1138_v8  ;;  %s1945_s30 = scalar_lea.vmem %s2169_s2, %s1742_s27  ;;  %s211_s17 = scalar_lea.vmem %s2171_s4, %s1743_s14 }
  0x13   : > { %1793 = vmatpush3.bf16.msra.mxu0 %v1138_v8  ;;  %v226_v11 = vld [vmem:[%s1945_s30] sm:$0xff]   ;;  %v1659_v12 = vld [vmem:[%s1945_s30 + $0x8] sm:$0xff]   ;;  %v1661_v13 = vld [vmem:[%s1945_s30 + $0x10] sm:$0xff]   ;;  %s1744_s18 = sshll.u32 %s2174_s21, 5 }
  0x14   : > { %1794 = vmatprep.subr.bf16.mxu0 %v1841_v7  ;;  %v227_v14 = vunpack.c.l.bf16 %v226_v11  ;;  %v249_v15 = vunpack.c.h.bf16 %v226_v11  ;;  %v272_v16 = vunpack.c.l.bf16 %v1659_v12  ;;  %v295_v17 = vunpack.c.h.bf16 %v1659_v12  ;;  %v1663_v18 = vld [vmem:[%s1945_s30 + $0x18] sm:$0xff]   ;;  %v1665_v32 = vld [vmem:[%s1945_s30 + $0x20] sm:$0xff]   ;;  %v1667_v33 = vld [vmem:[%s1945_s30 + $0x28] sm:$0xff]   ;;  %s216_s23 = scalar_lea.vmem %s2172_s5, %s1744_s18 }
  0x15   : > { %v318_v19 = vunpack.c.l.bf16 %v1661_v13  ;;  %v341_v20 = vunpack.c.h.bf16 %v1661_v13  ;;  %v364_v21 = vunpack.c.l.bf16 %v1663_v18  ;;  %v387_v22 = vunpack.c.h.bf16 %v1663_v18  ;;  %v1669_v34 = vld [vmem:[%s1945_s30 + $0x30] sm:$0xff]   ;;  %v1671_v39 = vld [vmem:[%s1945_s30 + $0x38] sm:$0xff]   ;;  %v1673_v52 = vld [vmem:[%s1945_s30 + $0x40] sm:$0xff]  }
  0x16   : > { %v233_v23 = vsel %vm232_vm2, %v227_v14, %v1918_v1  ;;  %v255_v24 = vsel %vm232_vm2, %v249_v15, %v1918_v1  ;;  %v278_v25 = vsel %vm232_vm2, %v272_v16, %v1918_v1  ;;  %v301_v26 = vsel %vm232_vm2, %v295_v17, %v1918_v1  ;;  %v1675_v53 = vld [vmem:[%s1945_s30 + $0x48] sm:$0xff]   ;;  %v1677_v58 = vld [vmem:[%s1945_s30 + $0x50] sm:$0xff]   ;;  %v1679_v4 = vld [vmem:[%s1945_s30 + $0x58] sm:$0xff]  }
  0x17   : > { %1795 = vmatpush3.bf16.msra.mxu0 %v1841_v7  ;;  %v234_v28 = vpack.c.bf16 %v1884_v27, %v233_v23  ;;  %v257_v29 = vpack.c.bf16 %v1884_v27, %v255_v24  ;;  %v280_v30 = vpack.c.bf16 %v1884_v27, %v278_v25  ;;  %v303_v31 = vpack.c.bf16 %v1884_v27, %v301_v26 }
  0x18   : > { %1796 = vmatprep.subr.bf16.mxu0 %v1842_v10  ;;  %v324_v35 = vsel %vm232_vm2, %v318_v19, %v1918_v1  ;;  %v347_v36 = vsel %vm232_vm2, %v341_v20, %v1918_v1  ;;  %v370_v37 = vsel %vm232_vm2, %v364_v21, %v1918_v1  ;;  %v393_v38 = vsel %vm232_vm2, %v387_v22, %v1918_v1  ;;  %v1681_v20 = vld [vmem:[%s1945_s30 + $0x60] sm:$0xff]  }
  0x19   : > { %237 = vst [vmem:[#allocation7] sm:$0xf] %v234_v28  ;;  %260 = vst [vmem:[#allocation7 + $0x4] sm:$0xf] %v257_v29  ;;  %v326_v40 = vpack.c.bf16 %v1884_v27, %v324_v35  ;;  %v349_v41 = vpack.c.bf16 %v1884_v27, %v347_v36  ;;  %v372_v42 = vpack.c.bf16 %v1884_v27, %v370_v37  ;;  %v410_v44 = vunpack.c.l.bf16 %v1665_v32  ;;  %v1685_v36 = vld [vmem:[%s1945_s30 + $0x70] sm:$0xff]   ;;  %v1687_v37 = vld [vmem:[%s1945_s30 + $0x78] sm:$0xff]  }
  0x1a   : > { %283 = vst [vmem:[#allocation7 + $0x8] sm:$0xf] %v280_v30  ;;  %306 = vst [vmem:[#allocation7 + $0xc] sm:$0xf] %v303_v31  ;;  %v395_v43 = vpack.c.bf16 %v1884_v27, %v393_v38  ;;  %v433_v45 = vunpack.c.h.bf16 %v1665_v32  ;;  %v456_v46 = vunpack.c.l.bf16 %v1667_v33  ;;  %v479_v47 = vunpack.c.h.bf16 %v1667_v33  ;;  %v1683_v31 = vld [vmem:[%s1945_s30 + $0x68] sm:$0xff]  }
  0x1b   : > { %1797 = vmatpush3.bf16.msra.mxu0 %v1842_v10  ;;  %329 = vst [vmem:[#allocation7 + $0x10] sm:$0xf] %v326_v40  ;;  %352 = vst [vmem:[#allocation7 + $0x14] sm:$0xf] %v349_v41  ;;  %v502_v48 = vunpack.c.l.bf16 %v1669_v34  ;;  %v525_v49 = vunpack.c.h.bf16 %v1669_v34  ;;  %v548_v50 = vunpack.c.l.bf16 %v1671_v39  ;;  %v571_v51 = vunpack.c.h.bf16 %v1671_v39 }
  0x1c   : > { %375 = vst [vmem:[#allocation7 + $0x18] sm:$0xf] %v372_v42  ;;  %398 = vst [vmem:[#allocation7 + $0x1c] sm:$0xf] %v395_v43  ;;  %v416_v54 = vsel %vm232_vm2, %v410_v44, %v1918_v1  ;;  %v439_v55 = vsel %vm232_vm2, %v433_v45, %v1918_v1  ;;  %v462_v56 = vsel %vm232_vm2, %v456_v46, %v1918_v1  ;;  %v594_v11 = vunpack.c.l.bf16 %v1673_v52 }
  0x1d   : > { %v485_v57 = vsel %vm232_vm2, %v479_v47, %v1918_v1  ;;  %v418_v59 = vpack.c.bf16 %v1884_v27, %v416_v54  ;;  %v441_v60 = vpack.c.bf16 %v1884_v27, %v439_v55  ;;  %v464_v61 = vpack.c.bf16 %v1884_v27, %v462_v56 }
  0x1e   : > { %v487_v62 = vpack.c.bf16 %v1884_v27, %v485_v57  ;;  %v508_v63 = vsel %vm232_vm2, %v502_v48, %v1918_v1  ;;  %v531_v0 = vsel %vm232_vm2, %v525_v49, %v1918_v1  ;;  %v554_v2 = vsel %vm232_vm2, %v548_v50, %v1918_v1 }
  0x1f   : > { %v577_v3 = vsel %vm232_vm2, %v571_v51, %v1918_v1  ;;  %421 = vst [vmem:[#allocation7 + $0x20] sm:$0xf] %v418_v59  ;;  %444 = vst [vmem:[#allocation7 + $0x24] sm:$0xf] %v441_v60  ;;  %v510_v5 = vpack.c.bf16 %v1884_v27, %v508_v63  ;;  %v533_v6 = vpack.c.bf16 %v1884_v27, %v531_v0  ;;  %v617_v12 = vunpack.c.h.bf16 %v1673_v52 }
  0x20   : > { %467 = vst [vmem:[#allocation7 + $0x28] sm:$0xf] %v464_v61  ;;  %490 = vst [vmem:[#allocation7 + $0x2c] sm:$0xf] %v487_v62  ;;  %v556_v7 = vpack.c.bf16 %v1884_v27, %v554_v2  ;;  %v579_v8 = vpack.c.bf16 %v1884_v27, %v577_v3  ;;  %v1843_v10 = vld [vmem:[#allocation7] sm:$0xff]   ;;  %v640_v13 = vunpack.c.l.bf16 %v1675_v53  ;;  %v663_v14 = vunpack.c.h.bf16 %v1675_v53 }
  0x21   : > { %v1844_v15 = vld [vmem:[#allocation7 + $0x8] sm:$0xff]   ;;  %513 = vst [vmem:[#allocation7 + $0x30] sm:$0xf] %v510_v5  ;;  %536 = vst [vmem:[#allocation7 + $0x34] sm:$0xf] %v533_v6  ;;  %v686_v16 = vunpack.c.l.bf16 %v1677_v58  ;;  %v709_v17 = vunpack.c.h.bf16 %v1677_v58  ;;  %v732_v18 = vunpack.c.l.bf16 %v1679_v4  ;;  %v755_v19 = vunpack.c.h.bf16 %v1679_v4  ;;  %1798 = vmatprep.mubr.msk.bf16.mxu0 %vm1084_vm3, %v1843_v10 }
  0x22   : > { %559 = vst [vmem:[#allocation7 + $0x38] sm:$0xf] %v556_v7  ;;  %582 = vst [vmem:[#allocation7 + $0x3c] sm:$0xf] %v579_v8  ;;  %v1845_v21 = vld [vmem:[#allocation7 + $0x10] sm:$0xff]   ;;  %v600_v22 = vsel %vm232_vm2, %v594_v11, %v1918_v1  ;;  %v623_v23 = vsel %vm232_vm2, %v617_v12, %v1918_v1  ;;  %v646_v24 = vsel %vm232_vm2, %v640_v13, %v1918_v1  ;;  %1799 = vmatmul.mubr.msk.bf16.vlgmr.msra.gmra.mxu0 %vm1084_vm3, %v1844_v15  ;;  %v1859_v15 = vld [vmem:[%s2168_s1 + $0x78] sm:$0xff]  }
  0x23   : > { %v669_v25 = vsel %vm232_vm2, %v663_v14, %v1918_v1  ;;  %v602_v26 = vpack.c.bf16 %v1884_v27, %v600_v22  ;;  %v625_v28 = vpack.c.bf16 %v1884_v27, %v623_v23  ;;  %v648_v29 = vpack.c.bf16 %v1884_v27, %v646_v24  ;;  %1802 = vmatprep.mubr.msk.bf16.mxu0 %vm1084_vm3, %v1845_v21  ;;  %v1846_v46 = vld [vmem:[#allocation7 + $0x18] sm:$0xff]   ;;  %v1865_v21 = vld [vmem:[%s2168_s1 + $0x60] sm:$0xff]  }
  0x24   : > { %v671_v30 = vpack.c.bf16 %v1884_v27, %v669_v25  ;;  %v692_v32 = vsel %vm232_vm2, %v686_v16, %v1918_v1  ;;  %v715_v33 = vsel %vm232_vm2, %v709_v17, %v1918_v1  ;;  %v738_v34 = vsel %vm232_vm2, %v732_v18, %v1918_v1  ;;  %v1860_v16 = vld [vmem:[%s2168_s1 + $0x38] sm:$0xff]   ;;  %v1861_v17 = vld [vmem:[%s2168_s1 + $0x70] sm:$0xff]   ;;  %1764 = vmatprep.subr.bf16.mxu1 %v1859_v15  ;;  %v1866_v22 = vld [vmem:[%s2168_s1 + $0x20] sm:$0xff]  }
  0x25   : > { %v761_v35 = vsel %vm232_vm2, %v755_v19, %v1918_v1  ;;  %605 = vst [vmem:[#allocation7 + $0x40] sm:$0xf] %v602_v26  ;;  %628 = vst [vmem:[#allocation7 + $0x44] sm:$0xf] %v625_v28  ;;  %v694_v38 = vpack.c.bf16 %v1884_v27, %v692_v32  ;;  %v717_v39 = vpack.c.bf16 %v1884_v27, %v715_v33  ;;  %v778_v42 = vunpack.c.l.bf16 %v1681_v20  ;;  %v1862_v18 = vld [vmem:[%s2168_s1 + $0x30] sm:$0xff]   ;;  %v1863_v19 = vld [vmem:[%s2168_s1 + $0x68] sm:$0xff]  }
  0x26   : > { %651 = vst [vmem:[#allocation7 + $0x48] sm:$0xf] %v648_v29  ;;  %674 = vst [vmem:[#allocation7 + $0x4c] sm:$0xf] %v671_v30  ;;  %v740_v40 = vpack.c.bf16 %v1884_v27, %v738_v34  ;;  %v763_v41 = vpack.c.bf16 %v1884_v27, %v761_v35  ;;  %v801_v43 = vunpack.c.h.bf16 %v1681_v20  ;;  %v824_v44 = vunpack.c.l.bf16 %v1683_v31  ;;  %v1847_v51 = vld [vmem:[#allocation7 + $0x20] sm:$0xff]   ;;  %1765 = vmatpush3.bf16.msra.mxu1 %v1860_v16  ;;  %v1864_v20 = vld [vmem:[%s2168_s1 + $0x28] sm:$0xff]  }
  0x27   : > { %v847_v45 = vunpack.c.h.bf16 %v1683_v31  ;;  %697 = vst [vmem:[#allocation7 + $0x50] sm:$0xf] %v694_v38  ;;  %720 = vst [vmem:[#allocation7 + $0x54] sm:$0xf] %v717_v39  ;;  %v870_v47 = vunpack.c.l.bf16 %v1685_v36  ;;  %v893_v48 = vunpack.c.h.bf16 %v1685_v36  ;;  %v916_v49 = vunpack.c.l.bf16 %v1687_v37  ;;  %v1848_v9 = vld [vmem:[#allocation7 + $0x28] sm:$0xff]   ;;  %1766 = vmatprep.subr.bf16.mxu1 %v1861_v17  ;;  %v1867_v23 = vld [vmem:[%s2168_s1 + $0x58] sm:$0xff]  }
  0x28   : > { %743 = vst [vmem:[#allocation7 + $0x58] sm:$0xf] %v740_v40  ;;  %766 = vst [vmem:[#allocation7 + $0x5c] sm:$0xf] %v763_v41  ;;  %v939_v50 = vunpack.c.h.bf16 %v1687_v37  ;;  %v784_v52 = vsel %vm232_vm2, %v778_v42, %v1918_v1  ;;  %v807_v53 = vsel %vm232_vm2, %v801_v43, %v1918_v1  ;;  %v830_v54 = vsel %vm232_vm2, %v824_v44, %v1918_v1  ;;  %v1849_v5 = vld [vmem:[#allocation7 + $0x30] sm:$0xff]   ;;  %v1868_v24 = vld [vmem:[%s2168_s1 + $0x18] sm:$0xff]  }
  0x29   : > { %v853_v55 = vsel %vm232_vm2, %v847_v45, %v1918_v1  ;;  %v786_v56 = vpack.c.bf16 %v1884_v27, %v784_v52  ;;  %v809_v57 = vpack.c.bf16 %v1884_v27, %v807_v53  ;;  %v832_v58 = vpack.c.bf16 %v1884_v27, %v830_v54  ;;  %v1850_v6 = vld [vmem:[#allocation7 + $0x38] sm:$0xff]   ;;  %v1869_v25 = vld [vmem:[%s2168_s1 + $0x50] sm:$0xff]   ;;  %v1871_v29 = vld [vmem:[%s2168_s1 + $0x48] sm:$0xff]  }
  0x2a   : > { %v855_v59 = vpack.c.bf16 %v1884_v27, %v853_v55  ;;  %v876_v60 = vsel %vm232_vm2, %v870_v47, %v1918_v1  ;;  %v899_v61 = vsel %vm232_vm2, %v893_v48, %v1918_v1  ;;  %v922_v62 = vsel %vm232_vm2, %v916_v49, %v1918_v1  ;;  %1803 = vmatmul.mubr.msk.bf16.gmra.mxu0 %vm1084_vm3, %v1846_v46  ;;  %v1870_v26 = vld [vmem:[%s2168_s1 + $0x10] sm:$0xff]   ;;  %v1872_v45 = vld [vmem:[%s2168_s1 + $0x8] sm:$0xff]   ;;  %v1873_v47 = vld [vmem:[%s2168_s1 + $0x40] sm:$0xff]  }
  0x2b   : > { %v945_v63 = vsel %vm232_vm2, %v939_v50, %v1918_v1  ;;  %789 = vst [vmem:[#allocation7 + $0x60] sm:$0xf] %v786_v56  ;;  %812 = vst [vmem:[#allocation7 + $0x64] sm:$0xf] %v809_v57  ;;  %v878_v0 = vpack.c.bf16 %v1884_v27, %v876_v60  ;;  %v901_v2 = vpack.c.bf16 %v1884_v27, %v899_v61  ;;  %1806 = vmatprep.mubr.msk.bf16.mxu0 %vm1084_vm3, %v1847_v51  ;;  %v1874_v49 = vld [vmem:[%s2168_s1] sm:$0xff]  }
  0x2c   : > { %835 = vst [vmem:[#allocation7 + $0x68] sm:$0xf] %v832_v58  ;;  %858 = vst [vmem:[#allocation7 + $0x6c] sm:$0xf] %v855_v59  ;;  %v924_v3 = vpack.c.bf16 %v1884_v27, %v922_v62  ;;  %v947_v4 = vpack.c.bf16 %v1884_v27, %v945_v63  ;;  %v1851_v7 = vld [vmem:[#allocation7 + $0x40] sm:$0xff]   ;;  %1767 = vmatpush3.bf16.msra.mxu1 %v1862_v18 }
  0x2d   : > { %881 = vst [vmem:[#allocation7 + $0x70] sm:$0xf] %v878_v0  ;;  %904 = vst [vmem:[#allocation7 + $0x74] sm:$0xf] %v901_v2  ;;  %v1852_v8 = vld [vmem:[#allocation7 + $0x48] sm:$0xff]   ;;  %1768 = vmatprep.subr.bf16.mxu1 %v1863_v19 }
  0x2e   : > { %927 = vst [vmem:[#allocation7 + $0x78] sm:$0xf] %v924_v3  ;;  %950 = vst [vmem:[#allocation7 + $0x7c] sm:$0xf] %v947_v4  ;;  %v1853_v27 = vld [vmem:[#allocation7 + $0x50] sm:$0xff]  }
  0x2f   : > { %v1854_v10 = vld [vmem:[#allocation7 + $0x58] sm:$0xff]  }
  0x30   : > { %1769 = vmatpush3.bf16.msra.mxu1 %v1864_v20 }
  0x31   : > { %1770 = vmatprep.subr.bf16.mxu1 %v1865_v21 }
  0x32   : > { %1807 = vmatmul.mubr.msk.bf16.gmra.mxu0 %vm1084_vm3, %v1848_v9  ;;  %v1855_v11 = vld [vmem:[#allocation7 + $0x60] sm:$0xff]  }
  0x33   : > { %1810 = vmatprep.mubr.msk.bf16.mxu0 %vm1084_vm3, %v1849_v5  ;;  %v1856_v12 = vld [vmem:[#allocation7 + $0x68] sm:$0xff]  }
  0x34   : > { %v1857_v13 = vld [vmem:[#allocation7 + $0x70] sm:$0xff]   ;;  %1771 = vmatpush3.bf16.msra.mxu1 %v1866_v22 }
  0x35   : > { %v1858_v14 = vld [vmem:[#allocation7 + $0x78] sm:$0xff]   ;;  %1772 = vmatprep.subr.bf16.mxu1 %v1867_v23 }
  0x38   : > { %1773 = vmatpush3.bf16.msra.mxu1 %v1868_v24 }
  0x39   : > { %1774 = vmatprep.subr.bf16.mxu1 %v1869_v25 }
  0x3a   : > { %1811 = vmatmul.mubr.msk.bf16.gmra.mxu0 %vm1084_vm3, %v1850_v6 }
  0x3b   : > { %1814 = vmatprep.mubr.msk.bf16.mxu0 %vm1084_vm3, %v1851_v7 }
  0x3c   : > { %1775 = vmatpush3.bf16.msra.mxu1 %v1870_v26 }
  0x3d   : > { %1776 = vmatprep.subr.bf16.mxu1 %v1871_v29 }
  0x40   : > { %1777 = vmatpush3.bf16.msra.mxu1 %v1872_v45 }
  0x41   : > { %1778 = vmatprep.subr.bf16.mxu1 %v1873_v47 }
  0x42   : > { %1815 = vmatmul.mubr.msk.bf16.gmra.mxu0 %vm1084_vm3, %v1852_v8 }
  0x43   : > { %1818 = vmatprep.mubr.msk.bf16.mxu0 %vm1084_vm3, %v1853_v27 }
  0x44   : > { %1779 = vmatpush3.bf16.msra.mxu1 %v1874_v49 }
  0x4a   : > { %1819 = vmatmul.mubr.msk.bf16.gmra.mxu0 %vm1084_vm3, %v1854_v10 }
  0x4b   : > { %1822 = vmatprep.mubr.msk.bf16.mxu0 %vm1084_vm3, %v1855_v11 }
  0x52   : > { %1823 = vmatmul.mubr.msk.bf16.gmra.mxu0 %vm1084_vm3, %v1856_v12 }
  0x53   : > { %1826 = vmatprep.mubr.msk.bf16.mxu0 %vm1084_vm3, %v1857_v13 }
  0x5a   : > { %1827 = vmatmul.mubr.msk.bf16.gmra.mxu0 %vm1084_vm3, %v1858_v14 }
  0xe2   : > { %v1800_v28 = vpop.f32.mrf.mxu0 }
  0xe4   : > { %v1174_v30 = vpop.f32.mrf.mxu0 }
  0xe5   : > { %1301 = vxpose.xlu1.b32.start [1/16] (narrow) %v1174_v30, 32 }
  0xe6   : > { %v1801_v31 = vpop.f32.mrf.mxu0 }
  0xe8   : > { %v1177_v32 = vpop.f32.mrf.mxu0 }
  0xe9   : > { %1302 = vxpose.xlu1.b32.cont [2/16] (narrow) %v1177_v32, 32 }
  0xea   : > { %v1804_v33 = vpop.f32.mrf.mxu0 }
  0xec   : > { %v1190_v34 = vpop.f32.mrf.mxu0 }
  0xed   : > { %1303 = vxpose.xlu1.b32.cont [3/16] (narrow) %v1800_v28, 32 }
  0xee   : > { %v1805_v35 = vpop.f32.mrf.mxu0 }
  0xf0   : > { %v1193_v36 = vpop.f32.mrf.mxu0 }
  0xf1   : > { %1304 = vxpose.xlu1.b32.cont [4/16] (narrow) %v1801_v31, 32 }
  0xf2   : > { %v1808_v37 = vpop.f32.mrf.mxu0 }
  0xf4   : > { %v1206_v38 = vpop.f32.mrf.mxu0 }
  0xf5   : > { %1305 = vxpose.xlu1.b32.cont [5/16] (narrow) %v1190_v34, 32 }
  0xf6   : > { %v1809_v39 = vpop.f32.mrf.mxu0 }
  0xf8   : > { %v1209_v40 = vpop.f32.mrf.mxu0 }
  0xf9   : > { %1306 = vxpose.xlu1.b32.cont [6/16] (narrow) %v1193_v36, 32 }
  0xfa   : > { %v1812_v41 = vpop.f32.mrf.mxu0 }
  0xfc   : > { %v1222_v42 = vpop.f32.mrf.mxu0 }
  0xfd   : > { %1307 = vxpose.xlu1.b32.cont [7/16] (narrow) %v1804_v33, 32 }
  0xfe   : > { %v1813_v43 = vpop.f32.mrf.mxu0 }
 0x100   : > { %v1225_v44 = vpop.f32.mrf.mxu0 }
 0x101   : > { %1308 = vxpose.xlu1.b32.cont [8/16] (narrow) %v1805_v35, 32 }
 0x102   : > { %v1816_v46 = vpop.f32.mrf.mxu0 }
 0x104   : > { %v1238_v48 = vpop.f32.mrf.mxu0 }
 0x105   : > { %1309 = vxpose.xlu1.b32.cont [9/16] (narrow) %v1206_v38, 32  ;;  %1333 = vxpose.xlu0.b32.start [1/16] (narrow) %v1238_v48, 32 }
 0x106   : > { %v1817_v50 = vpop.f32.mrf.mxu0 }
 0x108   : > { %v1241_v51 = vpop.f32.mrf.mxu0 }
 0x109   : > { %1310 = vxpose.xlu1.b32.cont [10/16] (narrow) %v1209_v40, 32  ;;  %1334 = vxpose.xlu0.b32.cont [2/16] (narrow) %v1241_v51, 32 }
 0x10a   : > { %v1820_v52 = vpop.f32.mrf.mxu0 }
 0x10c   : > { %v1254_v53 = vpop.f32.mrf.mxu0 }
 0x10d   : > { %1311 = vxpose.xlu1.b32.cont [11/16] (narrow) %v1808_v37, 32  ;;  %1335 = vxpose.xlu0.b32.cont [3/16] (narrow) %v1816_v46, 32 }
 0x10e   : > { %v1821_v54 = vpop.f32.mrf.mxu0 }
 0x110   : > { %v1257_v55 = vpop.f32.mrf.mxu0 }
 0x111   : > { %1312 = vxpose.xlu1.b32.cont [12/16] (narrow) %v1809_v39, 32  ;;  %1336 = vxpose.xlu0.b32.cont [4/16] (narrow) %v1817_v50, 32 }
 0x112   : > { %v1824_v56 = vpop.f32.mrf.mxu0 }
 0x114   : > { %v1270_v57 = vpop.f32.mrf.mxu0 }
 0x115   : > { %1313 = vxpose.xlu1.b32.cont [13/16] (narrow) %v1222_v42, 32  ;;  %1337 = vxpose.xlu0.b32.cont [5/16] (narrow) %v1254_v53, 32 }
 0x116   : > { %v1825_v58 = vpop.f32.mrf.mxu0 }
 0x118   : > { %v1273_v59 = vpop.f32.mrf.mxu0 }
 0x119   : > { %1314 = vxpose.xlu1.b32.cont [14/16] (narrow) %v1225_v44, 32  ;;  %1338 = vxpose.xlu0.b32.cont [6/16] (narrow) %v1257_v55, 32 }
 0x11a   : > { %v1828_v60 = vpop.f32.mrf.mxu0 }
 0x11c   : > { %v1286_v61 = vpop.f32.mrf.mxu0 }
 0x11d   : > { %1315 = vxpose.xlu1.b32.cont [15/16] (narrow) %v1812_v41, 32  ;;  %1339 = vxpose.xlu0.b32.cont [7/16] (narrow) %v1820_v52, 32 }
 0x11e   : > { %v1829_v62 = vpop.f32.mrf.mxu0 }
 0x120   : > { %v1289_v63 = vpop.f32.mrf.mxu0 }
 0x121   : > { %1316 = vxpose.xlu1.b32.end [16/16] (narrow) %v1813_v43, 32  ;;  %1340 = vxpose.xlu0.b32.cont [8/16] (narrow) %v1821_v54, 32 }
 0x125   : > { %1341 = vxpose.xlu0.b32.cont [9/16] (narrow) %v1270_v57, 32 }
 0x129   : > { %1342 = vxpose.xlu0.b32.cont [10/16] (narrow) %v1273_v59, 32 }
 0x12d   : > { %1343 = vxpose.xlu0.b32.cont [11/16] (narrow) %v1824_v56, 32 }
 0x131   : > { %1344 = vxpose.xlu0.b32.cont [12/16] (narrow) %v1825_v58, 32 }
 0x135   : > { %1345 = vxpose.xlu0.b32.cont [13/16] (narrow) %v1286_v61, 32 }
 0x139   : > { %1346 = vxpose.xlu0.b32.cont [14/16] (narrow) %v1289_v63, 32 }
 0x13d   : > { %1347 = vxpose.xlu0.b32.cont [15/16] (narrow) %v1828_v60, 32 }
 0x141   : > { %1348 = vxpose.xlu0.b32.end [16/16] (narrow) %v1829_v62, 32 }
 0x161   : > { %v1317_v0 = vpop.trf.xlu1 }
 0x162   : > { %1365 = vst [vmem:[%s211_s17] sm:$0xff] %v1317_v0 }
 0x165   : > { %v1318_v2 = vpop.trf.xlu1 }
 0x166   : > { %1367 = vst [vmem:[%s211_s17 + $0x10] sm:$0xff] %v1318_v2  ;;  %v1373_v7 = vpack.c.bf16 %v1318_v2, %v1317_v0 }
 0x169   : > { %v1319_v3 = vpop.trf.xlu1 }
 0x16a   : > { %1369 = vst [vmem:[%s211_s17 + $0x20] sm:$0xff] %v1319_v3 }
 0x16d   : > { %v1320_v4 = vpop.trf.xlu1 }
 0x16e   : > { %1371 = vst [vmem:[%s211_s17 + $0x30] sm:$0xff] %v1320_v4  ;;  %v1375_v11 = vpack.c.bf16 %v1320_v4, %v1319_v3 }
 0x181   : > { %v1349_v9 = vpop.trf.xlu0 }
 0x182   : > { %1366 = vst [vmem:[%s211_s17 + $0x8] sm:$0xff] %v1349_v9 }
 0x185   : > { %v1350_v5 = vpop.trf.xlu0 }
 0x186   : > { %1368 = vst [vmem:[%s211_s17 + $0x18] sm:$0xff] %v1350_v5  ;;  %v1374_v6 = vpack.c.bf16 %v1350_v5, %v1349_v9 }
 0x188   : > { %1537 = vmatprep.mubr.bf16.mxu1 %v1374_v6 }
 0x189   : > { %1538 = vmatmul.mubr.bf16.vlgmr.msra.gmra.mxu1 %v1373_v7  ;;  %v1351_v8 = vpop.trf.xlu0 }
 0x18a   : > { %1370 = vst [vmem:[%s211_s17 + $0x28] sm:$0xff] %v1351_v8 }
 0x18d   : > { %v1352_v27 = vpop.trf.xlu0 }
 0x18e   : > { %1372 = vst [vmem:[%s211_s17 + $0x38] sm:$0xff] %v1352_v27  ;;  %v1376_v10 = vpack.c.bf16 %v1352_v27, %v1351_v8 }
 0x190   : > { %1545 = vmatprep.mubr.bf16.mxu1 %v1376_v10 }
 0x191   : > { %1546 = vmatmul.mubr.bf16.gmra.mxu1 %v1375_v11 }
 0x249   : > { %v1780_v12 = vpop.f32.mrf.mxu1 }
 0x24b   : > { %v1781_v13 = vpop.f32.mrf.mxu1 }
 0x24c   : > { %v1782_v14 = vadd.f32 %v1781_v13, %v1780_v12 }
 0x24d   : > { %v1783_v15 = vpop.f32.mrf.mxu1 }
 0x24e   : > { %1555 = vst.msk [vmem:[%s216_s23] sm:$0xff] %vm1554_vm4, %v1782_v14 }
 0x24f   : > { %v1784_v16 = vpop.f32.mrf.mxu1 }
 0x250   : > { %v1785_v17 = vadd.f32 %v1784_v16, %v1783_v15 }
 0x251   : > { %v1786_v18 = vpop.f32.mrf.mxu1 }
 0x252   : > { %1556 = vst.msk [vmem:[%s216_s23 + $0x8] sm:$0xff] %vm1554_vm4, %v1785_v17 }
 0x253   : > { %v1787_v19 = vpop.f32.mrf.mxu1 }
 0x254   : > { %v1788_v20 = vadd.f32 %v1787_v19, %v1786_v18 }
 0x255   : > { %v1789_v21 = vpop.f32.mrf.mxu1 }
 0x256   : > { %1557 = vst.msk [vmem:[%s216_s23 + $0x10] sm:$0xff] %vm1554_vm4, %v1788_v20 }
 0x257   : > { %v1790_v22 = vpop.f32.mrf.mxu1 }
 0x258   : > { %v1791_v23 = vadd.f32 %v1790_v22, %v1789_v21 }
 0x25a   : > { %1558 = vst.msk [vmem:[%s216_s23 + $0x18] sm:$0xff] %vm1554_vm4, %v1791_v23 }
 0x25b PF: > { %s21_s20 = sadd.s32 1, %s1881_s20  }
 0x25c   : > { %p18_p4 = scmp.ge.s32.totalorder %s21_s20, 4  }
 0x25e   :  { %20 = sbr.rel (!%p18_p4) target bundleno = 3 (0x3), region = 136 }

</bundles_post_ra>
